<compile_context>
chip_gen: v5e
topology: v5e:2x2
jax: 0.10.0
libtpu: 0.0.40
codegen_flags: <defaults>
</compile_context>

<pallas_src>
import functools

import jax
import jax.numpy as jnp
from jax import lax
from jax.experimental import pallas as pl
from jax.experimental.pallas import tpu as pltpu


def _largest_divisor_leq(n, cap):
    cap = max(1, min(n, cap))
    for d in range(cap, 0, -1):
        if n % d == 0:
            return d
    return 1


# --------------------------- kernel 1: per-group stats ---------------------------
def _stats_kernel(x_ref, mean_ref, cov_ref, *, inv_nm1):
    # x_ref: (Gt, N, D) -- Gt independent (batch, view) groups per grid step.
    x = x_ref[...]
    mean = jnp.mean(x, axis=1)                          # (Gt, D)
    diffs = x - mean[:, None, :]                        # (Gt, N, D)
    # Batched diffs^T @ diffs on the MXU: batch dim 0, contract over the N axis.
    prods = lax.dot_general(
        diffs, diffs,
        dimension_numbers=(((1,), (1,)), ((0,), (0,))),
        preferred_element_type=jnp.float32)             # (Gt, D, D)
    mean_ref[0] = mean                                  # lane-packed (Gt, D)
    cov_ref[0] = prods * inv_nm1                        # (Gt, D, D)


# ----------------------- kernel 2: contrastive loss reduction --------------------
def _loss_kernel(quad_ref, out_ref, *, tau):
    # quad_ref: (Bt, K, K) Mahalanobis quadratic forms; out_ref: (1, Bt, 1).
    q = jnp.maximum(quad_ref[...], 0.0)                 # clamp fp-negative before sqrt
    k = q.shape[1]
    w = jnp.exp(-jnp.sqrt(q) * tau)                     # (Bt, K, K)
    ii = lax.broadcasted_iota(jnp.int32, (1, k, k), 1)
    jj = lax.broadcasted_iota(jnp.int32, (1, k, k), 2)
    diag = jnp.sum(jnp.where(ii == jj, w, 0.0), axis=2)     # (Bt, K) = w[b, i, i]
    row_sum = jnp.sum(w, axis=2)                             # (Bt, K): anchors p1_i
    col_sum = jnp.sum(w, axis=1)                             # (Bt, K): anchors p2_i
    per_anchor = -jnp.log(diag / row_sum) - jnp.log(diag / col_sum)   # (Bt, K)
    # per-batch (loss1_b + loss2_b) / K
    out_ref[0] = jnp.sum(per_anchor, axis=1, keepdims=True) * (1.0 / k)


# ------------------------------------ wrapper -------------------------------------
def contrastive_loss_pallas(feat_p1, feat_p2, tau=0.1):
    feat_p1 = feat_p1.astype(jnp.float32)
    feat_p2 = feat_p2.astype(jnp.float32)
    B, K, N, D = feat_p1.shape
    assert feat_p2.shape == (B, K, N, D)
    G = B * K

    # ---- kernel 1 tiling: batch Gt groups per step, budget blocks for all chips
    # (target ~4 MiB of live block bytes -> <16 MiB with double-buffering, safe on
    #  v5e default scoped VMEM and v7x's 64 MiB physical VMEM).
    per_group_bytes = (N * D + D + D * D) * 4
    gt_cap = max(1, min(128, (4 << 20) // per_group_bytes))
    Gt = _largest_divisor_leq(G, gt_cap)
    n_gchunks = G // Gt

    stats_kernel = functools.partial(_stats_kernel, inv_nm1=1.0 / (N - 1))
    stats_call = pl.pallas_call(
        stats_kernel,
        out_shape=(jax.ShapeDtypeStruct((n_gchunks, Gt, D), jnp.float32),
                   jax.ShapeDtypeStruct((n_gchunks, Gt, D, D), jnp.float32)),
        grid_spec=pltpu.PrefetchScalarGridSpec(
            num_scalar_prefetch=0,
            grid=(n_gchunks,),
            in_specs=[pl.BlockSpec((Gt, N, D), lambda c: (c, 0, 0))],
            out_specs=[pl.BlockSpec((1, Gt, D), lambda c: (c, 0, 0)),
                       pl.BlockSpec((1, Gt, D, D), lambda c: (c, 0, 0, 0))]),
        compiler_params=pltpu.CompilerParams(
            dimension_semantics=("parallel",),
            vmem_limit_bytes=32 << 20),
    )

    def run_stats(x):
        means, covs = stats_call(x.reshape(G, N, D))   # contiguous reshape, no copy
        return means.reshape(B, K, D), covs.reshape(B, K, D, D)

    mu1, cov1 = run_stats(feat_p1)   # two calls: no concat staging copy of the inputs
    mu2, cov2 = run_stats(feat_p2)

    # ---- glue: SPD solve replaces SVD-based pinv ----------------------------------
    eps = 1e-4 * jnp.eye(D, dtype=jnp.float32)
    avg_cov = 0.5 * (cov1[:, :, None] + cov2[:, None, :]) + eps       # (B, K, K, D, D)
    delta = mu1[:, :, None, :] - mu2[:, None, :, :]                   # (B, K, K, D)
    # avg_cov is symmetric positive-definite thanks to the +eps*I regularizer, so
    # pinv == inv and a Cholesky/triangular solve is numerically equivalent but far
    # cheaper than SVD.  (If the eps regularizer were removed, fall back to pinv.)
    # TODO(synk): batched dense Cholesky/triangular solve has no clean Pallas
    # equivalent; computed in plain JAX glue.
    chol = jnp.linalg.cholesky(avg_cov)                               # (B, K, K, D, D)
    z = lax.linalg.triangular_solve(chol, delta[..., None],
                                    left_side=True, lower=True)       # L z = delta
    quad = jnp.sum(jnp.square(z[..., 0]), axis=-1)                    # (B, K, K)

    # ---- kernel 2: Bt batches per step, disjoint outputs (parallel, no accumulator)
    Bt = _largest_divisor_leq(B, max(1, B // 2)) if B > 1 else 1
    n_bchunks = B // Bt
    loss_kernel = functools.partial(_loss_kernel, tau=float(tau))
    per_batch = pl.pallas_call(
        loss_kernel,
        out_shape=jax.ShapeDtypeStruct((n_bchunks, Bt, 1), jnp.float32),
        grid_spec=pltpu.PrefetchScalarGridSpec(
            num_scalar_prefetch=0,
            grid=(n_bchunks,),
            in_specs=[pl.BlockSpec((Bt, K, K), lambda c: (c, 0, 0))],
            out_specs=pl.BlockSpec((1, Bt, 1), lambda c: (c, 0, 0))),
        compiler_params=pltpu.CompilerParams(
            dimension_semantics=("parallel",),
            vmem_limit_bytes=32 << 20),
    )(quad)

    return jnp.sum(per_batch) / B


# ---------------- pure-JAX reference (mirrors the PyTorch code) ----------------
def _ref_contrastive_loss(p1, p2, tau=0.1):
    B, K, N, D = p1.shape

    def param(x):                          # x: (B, N, D)
        mean = jnp.mean(x, axis=1, keepdims=True)
        diffs = x - mean
        prods = jnp.einsum('bnd,bne->bde', diffs, diffs)
        return mean, prods / (N - 1)

    def distance(f1, f2):
        m1, c1 = param(f1)
        m2, c2 = param(f2)
        eps = 1e-4 * jnp.eye(D, dtype=f1.dtype)
        delta = m1 - m2                    # (B, 1, D)
        m = jnp.matmul(jnp.linalg.pinv((c1 + c2) / 2 + eps),
                       jnp.swapaxes(delta, 1, 2))
        dist = jnp.matmul(delta, m)        # (B, 1, 1)
        return jnp.sqrt(dist)[..., 0]      # (B, 1)

    def niqe(anc, view, idx):
        pos = None
        neg = 0.0
        for i in range(K):
            d = jnp.exp(-distance(anc, view[:, i]) * tau)
            if i == idx:
                pos = d
            else:
                neg = neg + d
        return -jnp.log(pos / (pos + neg))

    loss1 = 0.0
    loss2 = 0.0
    for i in range(K):
        loss1 = loss1 + niqe(p1[:, i], p2, i)
        loss2 = loss2 + niqe(p2[:, i], p1, i)
    return jnp.mean((loss1 + loss2) / K)


if __name__ == "__main__":
    key = jax.random.PRNGKey(0)
    k1, k2 = jax.random.split(key)
    B, K, N, D = 2, 3, 32, 8
    feat_p1 = jax.random.normal(k1, (B, K, N, D), dtype=jnp.float32)
    feat_p2 = jax.random.normal(k2, (B, K, N, D), dtype=jnp.float32)

    out = contrastive_loss_pallas(feat_p1, feat_p2)
    out = jax.block_until_ready(out)

    ref = jax.block_until_ready(_ref_contrastive_loss(feat_p1, feat_p2))
    assert bool(jnp.isfinite(out)), "kernel produced non-finite loss"
    assert abs(float(out) - float(ref)) < 1e-3, (float(out), float(ref))
    print("KERNEL_OK")
</pallas_src>

<mosaic_0001>
module attributes {stable_mosaic.version = 11 : i64} {
  func.func @_stats_kernel(%arg0: i32, %arg1: memref<6x32x8xf32, #tpu.memory_space<vmem>>, %arg2: memref<1x6x8xf32, #tpu.memory_space<vmem>>, %arg3: memref<1x6x8x8xf32, #tpu.memory_space<vmem>>) attributes {dimension_semantics = [#tpu.dimension_semantics<parallel>], iteration_bounds = array<i64: 1>, scalar_prefetch = 0 : i64, scratch_operands = 0 : i64, tpu.core_type = #tpu.core_type<tc>, window_params = [{transform_indices = @transform_0, window_bounds = array<i64: 6, 32, 8>}, {transform_indices = @transform_1, window_bounds = array<i64: 1, 6, 8>}, {transform_indices = @transform_2, window_bounds = array<i64: 1, 6, 8, 8>}]} {
    %c0 = arith.constant 0 : index
    %c0_0 = arith.constant 0 : index
    %c0_1 = arith.constant 0 : index
    %0 = vector.load %arg1[%c0, %c0_0, %c0_1] : memref<6x32x8xf32, #tpu.memory_space<vmem>>, vector<6x32x8xf32>
    %cst = arith.constant dense<0.000000e+00> : vector<6x8xf32>
    %1 = vector.multi_reduction <add>, %0, %cst [1] : vector<6x32x8xf32> to vector<6x8xf32>
    %cst_2 = arith.constant 3.200000e+01 : f32
    %2 = vector.broadcast %cst_2 : f32 to vector<6x8xf32>
    %3 = arith.divf %1, %2 : vector<6x8xf32>
    %4 = vector.shape_cast %3 : vector<6x8xf32> to vector<6x1x8xf32>
    %5 = vector.broadcast %4 : vector<6x1x8xf32> to vector<6x32x8xf32>
    %6 = arith.subf %0, %5 : vector<6x32x8xf32>
    %cst_3 = arith.constant dense<0.000000e+00> : vector<6x8x8xf32>
    %7 = tpu.matmul %6, %6, %cst_3 {dimension_numbers = #tpu.dot_dimension_numbers<[1], [1], [2], [2], [0, 0, 0, 2, 1, 2], [0], [0]>} : vector<6x32x8xf32>, vector<6x32x8xf32>, vector<6x8x8xf32> -> vector<6x8x8xf32>
    %c0_4 = arith.constant 0 : index
    %c0_5 = arith.constant 0 : index
    %c0_6 = arith.constant 0 : index
    %8 = vector.load %arg2[%c0_4, %c0_5, %c0_6] : memref<1x6x8xf32, #tpu.memory_space<vmem>>, vector<1x6x8xf32>
    %9 = vector.shape_cast %8 : vector<1x6x8xf32> to vector<6x8xf32>
    %10 = vector.shape_cast %3 : vector<6x8xf32> to vector<1x6x8xf32>
    tpu.vector_store %arg2[%c0_4, %c0_5, %c0_6], %10 {strides = array<i32>} : memref<1x6x8xf32, #tpu.memory_space<vmem>>, vector<1x6x8xf32>,
    %cst_7 = arith.constant 0.0322580636 : f32
    %11 = vector.broadcast %cst_7 : f32 to vector<6x8x8xf32>
    %12 = arith.mulf %7, %11 : vector<6x8x8xf32>
    %c0_8 = arith.constant 0 : index
    %c0_9 = arith.constant 0 : index
    %c0_10 = arith.constant 0 : index
    %c0_11 = arith.constant 0 : index
    %13 = vector.load %arg3[%c0_8, %c0_9, %c0_10, %c0_11] : memref<1x6x8x8xf32, #tpu.memory_space<vmem>>, vector<1x6x8x8xf32>
    %14 = vector.shape_cast %13 : vector<1x6x8x8xf32> to vector<6x8x8xf32>
    %15 = vector.shape_cast %12 : vector<6x8x8xf32> to vector<1x6x8x8xf32>
    tpu.vector_store %arg3[%c0_8, %c0_9, %c0_10, %c0_11], %15 {strides = array<i32>} : memref<1x6x8x8xf32, #tpu.memory_space<vmem>>, vector<1x6x8x8xf32>,
    return
  }
  func.func @transform_0(%arg0: i32) -> (i32, i32, i32) {
    %c0_i32 = arith.constant 0 : i32
    %c0_i32_0 = arith.constant 0 : i32
    %c0_i32_1 = arith.constant 0 : i32
    return %arg0, %c0_i32, %c0_i32_0 : i32, i32, i32
  }
  func.func @transform_1(%arg0: i32) -> (i32, i32, i32) {
    %c0_i32 = arith.constant 0 : i32
    %c0_i32_0 = arith.constant 0 : i32
    %c0_i32_1 = arith.constant 0 : i32
    return %arg0, %c0_i32, %c0_i32_0 : i32, i32, i32
  }
  func.func @transform_2(%arg0: i32) -> (i32, i32, i32, i32) {
    %c0_i32 = arith.constant 0 : i32
    %c0_i32_0 = arith.constant 0 : i32
    %c0_i32_1 = arith.constant 0 : i32
    %c0_i32_2 = arith.constant 0 : i32
    return %arg0, %c0_i32, %c0_i32_0, %c0_i32_1 : i32, i32, i32, i32
  }
}

</mosaic_0001>

<bundles_post_ra>
// kernel: tpu_custom_call.1
= control target key start
LH: loop header
LB: loop body
LE: loop exit
PB: predicated region body
PF: predicated region fallthrough
CT: control target
= control target key end

     0   :  { %vm35_vm0 = vcmask 64512   ;;  %v574_v7 = vmov 32.0   ;;  %s813_s0 = inlined_call_operand.vmem [shape: f32[6,32,8], index: 0, kind: input, shape index: {}]   ;;  %s814_s1 = inlined_call_operand.vmem [shape: f32[1,6,8], index: 1, kind: output, shape index: {0}]   ;;  %s815_s2 = inlined_call_operand.hbm [shape: f32[1,6,8,8], index: 2, kind: output, shape index: {1}]  }
   0x1   :  { %v596_v0 = vld [vmem:[%s813_s0] sm:$0xff]  ;;  %v601_v1 = vld [vmem:[%s813_s0 + $0x8] sm:$0xff]  ;;  %v606_v2 = vld [vmem:[%s813_s0 + $0x10] sm:$0xff]  ;;  %546 = vrcp.f32 %v574_v7 }
   0x2   :  { %v611_v3 = vld [vmem:[%s813_s0 + $0x18] sm:$0xff]  ;;  %v36_v4 = vsel %vm35_vm0, %v596_v0, 0.0  ;;  %v37_v5 = vsel %vm35_vm0, %v601_v1, 0.0  ;;  %v39_v6 = vsel %vm35_vm0, %v606_v2, 0.0  ;;  %v622_v8 = vld [vmem:[%s813_s0 + $0x20] sm:$0xff]  ;;  %v627_v9 = vld [vmem:[%s813_s0 + $0x28] sm:$0xff] }
   0x3   :  { %v38_v10 = vadd.f32 %v37_v5, %v36_v4  ;;  %v632_v11 = vld [vmem:[%s813_s0 + $0x30] sm:$0xff]  ;;  %v637_v12 = vld [vmem:[%s813_s0 + $0x38] sm:$0xff]  ;;  %v49_v13 = vsel %vm35_vm0, %v622_v8, 0.0  ;;  %v50_v14 = vsel %vm35_vm0, %v627_v9, 0.0  ;;  %v646_v15 = vld [vmem:[%s813_s0 + $0x40] sm:$0xff]  ;;  %v41_v16 = vsel %vm35_vm0, %v611_v3, 0.0 }
   0x4   :  { %v51_v17 = vadd.f32 %v50_v14, %v49_v13  ;;  %v52_v18 = vsel %vm35_vm0, %v632_v11, 0.0  ;;  %v655_v19 = vld [vmem:[%s813_s0 + $0x48] sm:$0xff]  ;;  %v660_v20 = vld [vmem:[%s813_s0 + $0x50] sm:$0xff]  ;;  %v665_v21 = vld [vmem:[%s813_s0 + $0x58] sm:$0xff]  ;;  %v62_v22 = vsel %vm35_vm0, %v646_v15, 0.0  ;;  %v54_v24 = vsel %vm35_vm0, %v637_v12, 0.0 }
   0x5   :  { %v40_v23 = vadd.f32 %v39_v6, %v38_v10  ;;  %v63_v25 = vsel %vm35_vm0, %v655_v19, 0.0  ;;  %v65_v26 = vsel %vm35_vm0, %v660_v20, 0.0  ;;  %v678_v27 = vld [vmem:[%s813_s0 + $0x60] sm:$0xff]  ;;  %v683_v28 = vld [vmem:[%s813_s0 + $0x68] sm:$0xff]  ;;  %v688_v29 = vld [vmem:[%s813_s0 + $0x70] sm:$0xff] }
   0x6   :  { %v53_v30 = vadd.f32 %v52_v18, %v51_v17  ;;  %v64_v31 = vadd.f32 %v63_v25, %v62_v22  ;;  %v693_v32 = vld [vmem:[%s813_s0 + $0x78] sm:$0xff]  ;;  %v75_v33 = vsel %vm35_vm0, %v678_v27, 0.0  ;;  %v76_v34 = vsel %vm35_vm0, %v683_v28, 0.0 }
   0x7   :  { %8 = vsyncpa [#allocation3], 0  ;;  %v42_v35 = vadd.f32 %v41_v16, %v40_v23  ;;  %v67_v36 = vsel %vm35_vm0, %v665_v21, 0.0  ;;  %v77_v37 = vadd.f32 %v76_v34, %v75_v33  ;;  %v78_v38 = vsel %vm35_vm0, %v688_v29, 0.0  ;;  %v706_v39 = vld [vmem:[%s813_s0 + $0x80] sm:$0xff]  ;;  %v711_v40 = vld [vmem:[%s813_s0 + $0x88] sm:$0xff]  ;;  %v547_v41 = vpop.eup %546 }
   0x8   :  { %v55_v42 = vadd.f32 %v54_v24, %v53_v30  ;;  %v66_v43 = vadd.f32 %v65_v26, %v64_v31  ;;  %v88_v44 = vsel %vm35_vm0, %v706_v39, 0.0  ;;  %v89_v45 = vsel %vm35_vm0, %v711_v40, 0.0  ;;  %v722_v49 = vld [vmem:[%s813_s0 + $0x90] sm:$0xff]  ;;  %v727_v56 = vld [vmem:[%s813_s0 + $0x98] sm:$0xff]  ;;  %v738_v30 = vld [vmem:[%s813_s0 + $0xa0] sm:$0xff]  ;;  %s521_s5 = sshll.u32 %s815_s2, 4  ;;  %s522_s5 = int_to_ptr.hbm [resolvable:$true] %s521_s5 }
   0x9   :  { %v43_v46 = vrot.slane %v42_v35, 4  ;;  %v115_v47 = vmul.f32 32.0, %v547_v41  ;;  %v80_v48 = vsel %vm35_vm0, %v693_v32, 0.0  ;;  %v79_v52 = vadd.f32 %v78_v38, %v77_v37  ;;  %v743_v31 = vld [vmem:[%s813_s0 + $0xa8] sm:$0xff]  ;;  %s576_s6 = smov 128   ;;  %s577_s7 = smov 8  }
   0xa   :  { %v56_v50 = vrot.slane %v55_v42, 4  ;;  %v68_v51 = vadd.f32 %v67_v36, %v66_v43  ;;  %v90_v53 = vadd.f32 %v89_v45, %v88_v44  ;;  %v91_v57 = vsel %vm35_vm0, %v722_v49, 0.0 }
   0xb   :  { %v44_v54 = vadd.f32 %v43_v46, %v42_v35  ;;  %v116_v55 = vsub.f32 1.0, %v115_v47  ;;  %v81_v60 = vadd.f32 %v80_v48, %v79_v52  ;;  %v93_v4 = vsel %vm35_vm0, %v727_v56, 0.0 }
   0xc   :  { %v57_v58 = vadd.f32 %v56_v50, %v55_v42  ;;  %v69_v59 = vrot.slane %v68_v51, 4  ;;  %v92_v61 = vadd.f32 %v91_v57, %v90_v53  ;;  %vm119_vm1 = vweird.f32 %v547_v41  ;;  %v752_v42 = vld [vmem:[%s813_s0 + $0xb0] sm:$0xff] }
   0xd   :  { %v45_v62 = vrot.slane %v44_v54, 2  ;;  %v117_v63 = vmul.f32 %v547_v41, %v116_v55  ;;  %v82_v7 = vrot.slane %v81_v60, 4  ;;  %v101_v35 = vsel %vm35_vm0, %v738_v30, 0.0 }
   0xe   :  { %v58_v5 = vrot.slane %v57_v58, 2  ;;  %v70_v6 = vadd.f32 %v69_v59, %v68_v51  ;;  %v94_v10 = vadd.f32 %v93_v4, %v92_v61  ;;  %v102_v36 = vsel %vm35_vm0, %v743_v31, 0.0 }
   0xf   :  { %v46_v13 = vadd.f32 %v45_v62, %v44_v54  ;;  %v118_v14 = vadd.f32 %v547_v41, %v117_v63  ;;  %v83_v18 = vadd.f32 %v82_v7, %v81_v60  ;;  %v103_v43 = vadd.f32 %v102_v36, %v101_v35  ;;  %v764_v54 = vld [vmem:[%s813_s0 + $0xb8] sm:$0xff] }
  0x10   :  { %v59_v16 = vadd.f32 %v58_v5, %v57_v58  ;;  %v71_v17 = vrot.slane %v70_v6, 2  ;;  %v95_v22 = vrot.slane %v94_v10, 4  ;;  %v104_v45 = vsel %vm35_vm0, %v752_v42, 0.0 }
  0x11   :  { %v47_v23 = vrot.slane %v46_v13, 1  ;;  %v733_v24 = vsel %vm119_vm1, %v547_v41, %v118_v14  ;;  %v84_v41 = vrot.slane %v83_v18, 2  ;;  %v105_v55 = vadd.f32 %v104_v45, %v103_v43 }
  0x12   :  { %v60_v25 = vrot.slane %v59_v16, 1  ;;  %v72_v26 = vadd.f32 %v71_v17, %v70_v6  ;;  %v96_v34 = vadd.f32 %v95_v22, %v94_v10  ;;  %v106_v60 = vsel %vm35_vm0, %v764_v54, 0.0 }
  0x13   :  { %v48_v33 = vadd.f32 %v47_v23, %v46_v13  ;;  %v85_v53 = vadd.f32 %v84_v41, %v83_v18  ;;  %vm488_vm2 = vcmask 1041409   ;;  %vm490_vm3 = vcmask 1042434  }
  0x14   :  { %v61_v37 = vadd.f32 %v60_v25, %v59_v16  ;;  %v73_v38 = vrot.slane %v72_v26, 1  ;;  %v97_v50 = vrot.slane %v96_v34, 2  ;;  %vm492_vm4 = vcmask 1043459  }
  0x15   :  { %v121_v44 = vmul.f32 %v733_v24, %v48_v33  ;;  %v86_v61 = vrot.slane %v85_v53, 1  ;;  %vm494_vm5 = vcmask 1044484   ;;  %vm496_vm6 = vcmask 1045509  }
  0x16   :  { %v122_v46 = vmul.f32 %v733_v24, %v61_v37  ;;  %v74_v47 = vadd.f32 %v73_v38, %v72_v26  ;;  %v98_v59 = vadd.f32 %v97_v50, %v96_v34  ;;  %vm499_vm7 = vcmask 62464  }
  0x17   :  { %v127_v48 = vsub.f32 %v596_v0, %v121_v44  ;;  %v767_v57 = vsub.f32 %v611_v3, %v121_v44  ;;  %v128_v62 = vsub.f32 %v601_v1, %v121_v44  ;;  %v87_v6 = vadd.f32 %v86_v61, %v85_v53 }
  0x18   :  { %v131_v51 = vsub.f32 %v622_v8, %v122_v46  ;;  %v123_v52 = vmul.f32 %v733_v24, %v74_v47  ;;  %v770_v58 = vsub.f32 %v637_v12, %v122_v46  ;;  %v129_v8 = vsub.f32 %v606_v2, %v121_v44 }
  0x19   :  { %151 = vxpose.xlu0.b32.start [1/4] (short) (narrow) %v127_v48, 8  ;;  %199 = vmatpush.msra.mxu0 %v767_v57  ;;  %v133_v3 = vsub.f32 %v632_v11, %v122_v46  ;;  %v107_v12 = vadd.f32 %v106_v60, %v105_v55  ;;  %v489_v63 = vsel %vm488_vm2, %v122_v46, %v121_v44  ;;  %v99_v4 = vrot.slane %v98_v59, 1 }
  0x1a   :  { %207 = vxpose.xlu1.b32.start [1/4] (short) (narrow) %v131_v51, 8  ;;  %v135_v0 = vsub.f32 %v646_v15, %v123_v52  ;;  %254 = vmatpush.msra.mxu1 %v770_v58  ;;  %v132_v15 = vsub.f32 %v627_v9, %v122_v46  ;;  %v136_v5 = vsub.f32 %v655_v19, %v123_v52  ;;  %vm183_vm8 = vcmask 261120  }
  0x1b   :  { %200 = vmatpush.msra.mxu0 %v129_v8  ;;  %v108_v2 = vrot.slane %v107_v12, 4  ;;  %v138_v7 = vsub.f32 %v665_v21, %v123_v52  ;;  %v137_v1 = vsub.f32 %v660_v20, %v123_v52  ;;  %v491_v9 = vsel %vm490_vm3, %v123_v52, %v489_v63 }
  0x1c   :  { %262 = vxpose.xlu2.b32.start [1/4] (short) (narrow) %v135_v0, 8  ;;  %255 = vmatpush.msra.mxu1 %v133_v3  ;;  %v100_v13 = vadd.f32 %v99_v4, %v98_v59  ;;  %v124_v14 = vmul.f32 %v733_v24, %v87_v6 }
  0x1d   :  { %201 = vmatpush.msra.mxu0 %v128_v62  ;;  %v109_v10 = vadd.f32 %v108_v2, %v107_v12  ;;  %309 = vmatpush.msra.mxu2 %v138_v7 }
  0x1e   :  { %256 = vmatpush.msra.mxu1 %v132_v15  ;;  %v493_v16 = vsel %vm492_vm4, %v124_v14, %v491_v9  ;;  %v125_v17 = vmul.f32 %v733_v24, %v100_v13  ;;  %v142_v23 = vsub.f32 %v693_v32, %v124_v14  ;;  %v141_v25 = vsub.f32 %v688_v29, %v124_v14 }
  0x1f   :  { %202 = vmatpush.msra.mxu0 %v127_v48  ;;  %v110_v11 = vrot.slane %v109_v10, 2  ;;  %310 = vmatpush.msra.mxu2 %v137_v1  ;;  %v140_v33 = vsub.f32 %v683_v28, %v124_v14  ;;  %v139_v34 = vsub.f32 %v678_v27, %v124_v14 }
  0x20   :  { %257 = vmatpush.msra.mxu1 %v131_v51  ;;  %v495_v20 = vsel %vm494_vm5, %v125_v17, %v493_v16  ;;  %364 = vmatpush.msra.mxu3 %v142_v23  ;;  %v145_v32 = vsub.f32 %v722_v49, %v125_v17  ;;  %v144_v28 = vsub.f32 %v711_v40, %v125_v17 }
  0x21   :  { %152 = vxpose.xlu0.b32.cont [2/4] (short) (narrow) %v128_v62, 8  ;;  %v111_v19 = vadd.f32 %v110_v11, %v109_v10  ;;  %311 = vmatpush.msra.mxu2 %v136_v5  ;;  %v143_v27 = vsub.f32 %v706_v39, %v125_v17 }
  0x22   :  { %208 = vxpose.xlu1.b32.cont [2/4] (short) (narrow) %v132_v15, 8  ;;  %365 = vmatpush.msra.mxu3 %v141_v25 }
  0x23   :  { %v112_v21 = vrot.slane %v111_v19, 1  ;;  %312 = vmatpush.msra.mxu2 %v135_v0 }
  0x24   :  { %263 = vxpose.xlu2.b32.cont [2/4] (short) (narrow) %v136_v5, 8  ;;  %366 = vmatpush.msra.mxu3 %v140_v33 }
  0x25   :  { %v113_v18 = vadd.f32 %v112_v21, %v111_v19 }
  0x26   :  { %367 = vmatpush.msra.mxu3 %v139_v34 }
  0x27   :  { %v126_v22 = vmul.f32 %v733_v24, %v113_v18  ;;  %v146_v24 = vsub.f32 %v727_v56, %v125_v17 }
  0x29   :  { %153 = vxpose.xlu0.b32.cont [3/4] (short) (narrow) %v129_v8, 8  ;;  %v497_v26 = vsel %vm496_vm6, %v126_v22, %v495_v20  ;;  %v150_v29 = vsub.f32 %v764_v54, %v126_v22  ;;  %419 = vmatpush.msrb.mxu0 %v146_v24  ;;  %v149_v35 = vsub.f32 %v752_v42, %v126_v22 }
  0x2a   :  { %209 = vxpose.xlu1.b32.cont [3/4] (short) (narrow) %v133_v3, 8  ;;  %500 = vst.msk [vmem:[%s814_s1] sm:$0x3f] %vm499_vm7, %v497_v26  ;;  %v148_v36 = vsub.f32 %v743_v31, %v126_v22  ;;  %v147_v56 = vsub.f32 %v738_v30, %v126_v22  ;;  %s575_s1 = smov [#allocation2]  }
  0x2b   :  { %474 = vmatpush.msrb.mxu1 %v150_v29  ;;  %420 = vmatpush.msrb.mxu0 %v145_v32  ;;  %s519_s30 = sshll.u32 %s575_s1, 4  ;;  %s520_s30 = int_to_ptr.vmem [resolvable:$true] %s519_s30 }
  0x2c   :  { %264 = vxpose.xlu2.b32.cont [3/4] (short) (narrow) %v137_v1, 8 }
  0x2d   :  { %475 = vmatpush.msrb.mxu1 %v149_v35  ;;  %421 = vmatpush.msrb.mxu0 %v144_v28 }
  0x2f   :  { %476 = vmatpush.msrb.mxu1 %v148_v36  ;;  %422 = vmatpush.msrb.mxu0 %v143_v27 }
  0x31   :  { %154 = vxpose.xlu0.b32.end [4/4] (short) (narrow) %v767_v57, 8  ;;  %477 = vmatpush.msrb.mxu1 %v147_v56 }
  0x32   :  { %210 = vxpose.xlu1.b32.end [4/4] (short) (narrow) %v770_v58, 8 }
  0x34   :  { %265 = vxpose.xlu2.b32.end [4/4] (short) (narrow) %v138_v7, 8 }
  0x39   :  { %317 = vxpose.xlu0.b32.start [1/4] (short) (narrow) %v139_v34, 8 }
  0x3a   :  { %372 = vxpose.xlu1.b32.start [1/4] (short) (narrow) %v143_v27, 8 }
  0x3c   :  { %427 = vxpose.xlu2.b32.start [1/4] (short) (narrow) %v147_v56, 8 }
  0x41   :  { %318 = vxpose.xlu0.b32.cont [2/4] (short) (narrow) %v140_v33, 8 }
  0x42   :  { %373 = vxpose.xlu1.b32.cont [2/4] (short) (narrow) %v144_v28, 8 }
  0x44   :  { %428 = vxpose.xlu2.b32.cont [2/4] (short) (narrow) %v148_v36, 8 }
  0x49   :  { %319 = vxpose.xlu0.b32.cont [3/4] (short) (narrow) %v141_v25, 8 }
  0x4a   :  { %374 = vxpose.xlu1.b32.cont [3/4] (short) (narrow) %v145_v32, 8 }
  0x4c   :  { %429 = vxpose.xlu2.b32.cont [3/4] (short) (narrow) %v149_v35, 8 }
  0x51   :  { %320 = vxpose.xlu0.b32.end [4/4] (short) (narrow) %v142_v23, 8 }
  0x52   :  { %375 = vxpose.xlu1.b32.end [4/4] (short) (narrow) %v146_v24, 8 }
  0x54   :  { %430 = vxpose.xlu2.b32.end [4/4] (short) (narrow) %v150_v29, 8 }
  0xb5   :  { %v278_v39 = vpop.trf.xlu2 }
  0xb6   :  { %537 = vmatmul.msk.f32.vlgmr.msra.gmra.mxu2 %vm183_vm8, %v278_v39 }
  0xbd   :  { %v167_v40 = vpop.trf.xlu0 }
  0xbe   :  { %535 = vmatmul.msk.f32.vlgmr.msra.gmra.mxu0 %vm183_vm8, %v167_v40  ;;  %v223_v49 = vpop.trf.xlu1 }
  0xbf   :  { %536 = vmatmul.msk.f32.vlgmr.msra.gmra.mxu1 %vm183_vm8, %v223_v49 }
  0xd5   :  { %v443_v30 = vpop.trf.xlu2 }
  0xd6   :  { %540 = vmatmul.msk.f32.vlgmr.msrb.gmra.mxu1 %vm183_vm8, %v443_v30 }
  0xdd   :  { %v333_v31 = vpop.trf.xlu0 }
  0xde   :  { %538 = vmatmul.msk.f32.vlgmr.msra.gmra.mxu3 %vm183_vm8, %v333_v31  ;;  %v388_v37 = vpop.trf.xlu1 }
  0xdf   :  { %539 = vmatmul.msk.f32.vlgmr.msrb.gmra.mxu0 %vm183_vm8, %v388_v37 }
 0x139   :  { %v314_v38 = vpop.f32.mrf.mxu2 }
 0x13a   :  { %v503_v41 = vmul.f32 0.032258064, %v314_v38 }
 0x13b   :  { %v204_v42 = vpop.f32.mrf.mxu0 }
 0x13c   :  { %v501_v43 = vmul.f32 0.032258064, %v204_v42  ;;  %v259_v44 = vpop.f32.mrf.mxu1  ;;  %509 = vst.msk [vmem:[#allocation2 + $0x10] sm:$0xff] %vm35_vm0, %v503_v41 }
 0x13d   :  { %v502_v45 = vmul.f32 0.032258064, %v259_v44 }
 0x13e   :  { %507 = vst.msk [vmem:[#allocation2] sm:$0xff] %vm35_vm0, %v501_v43 }
 0x13f   :  { %508 = vst.msk [vmem:[#allocation2 + $0x8] sm:$0xff] %vm35_vm0, %v502_v45 }
 0x153   :  { %v479_v46 = vpop.f32.mrf.mxu1 }
 0x154   :  { %v506_v47 = vmul.f32 0.032258064, %v479_v46 }
 0x156   :  { %512 = vst.msk [vmem:[#allocation2 + $0x28] sm:$0xff] %vm35_vm0, %v506_v47 }
 0x15c   :  { %v424_v48 = vpop.f32.mrf.mxu0 }
 0x15d   :  { %v505_v50 = vmul.f32 0.032258064, %v424_v48 }
 0x15f   :  { %511 = vst.msk [vmem:[#allocation2 + $0x20] sm:$0xff] %vm35_vm0, %v505_v50 }
 0x161   :  { %v369_v51 = vpop.f32.mrf.mxu3 }
 0x162   :  { %v504_v52 = vmul.f32 0.032258064, %v369_v51 }
 0x164   :  { %510 = vst.msk [vmem:[#allocation2 + $0x18] sm:$0xff] %vm35_vm0, %v504_v52 }
 0x165   :  { %527 = dma.vmem_to_hbm [thread:$0]  %s520_s30, 768, %s522_s5, [#allocation3], %s576_s6, %s576_s6, %s577_s7  }
 0x166   :  { %572 = dma.done.wait [#allocation3], 768  }
 0x167   :  { %573 = vsyncadd [#allocation3], 4294966528 }
 0x168   :  { %534 = vsyncpa [#allocation3], 1 }

</bundles_post_ra>
